<compile_context>
chip_gen: v6e
topology: v6e:2x2x1
jax: 0.10.0
libtpu: 0.0.40
codegen_flags: <defaults>
</compile_context>

<pallas_src>
import functools

import numpy as np
import jax
import jax.numpy as jnp
from jax.experimental import pallas as pl
from jax.experimental.pallas import tpu as pltpu


# ----------------------------- module helpers --------------------------------
def dimension_split(d, m):
    reminder = d % m
    quotient = d // m
    dims_width = [quotient + 1 if i < reminder else quotient for i in range(m)]
    ds = np.cumsum(dims_width)
    ds = np.insert(ds, 0, 0)
    return ds


# ------------------------------ Pallas kernel --------------------------------
def _pq_kernel(p_ref, w_ref, b_ref, o_ref):
    """One fused matmul per tile: [tp//r, r*K] @ [r*K, r*ks**m] + bias."""
    acc = jnp.dot(p_ref[...], w_ref[...], preferred_element_type=jnp.float32)
    o_ref[...] = (acc + b_ref[...]).astype(o_ref.dtype)


# ------------------------------ JAX glue --------------------------------------
def _im2col(x, kH, kW, stride, padding, dilation):
    """x: [N, C, H, W] -> patches [N*H_out*W_out, C*kH*kW] (C major; kh, kw minor)."""
    N, C, H, W = x.shape
    xp = jnp.pad(x, ((0, 0), (0, 0), (padding, padding), (padding, padding)))
    H_out = (H + 2 * padding - dilation * (kH - 1) - 1) // stride + 1
    W_out = (W + 2 * padding - dilation * (kW - 1) - 1) // stride + 1
    cols = []
    for kh in range(kH):
        for kw in range(kW):
            hs, ws = kh * dilation, kw * dilation
            sl = xp[:, :,
                    hs:hs + stride * (H_out - 1) + 1:stride,
                    ws:ws + stride * (W_out - 1) + 1:stride]
            cols.append(sl)  # [N, C, H_out, W_out]
    patches = jnp.stack(cols, axis=2)                 # [N, C, kH*kW, H_out, W_out]
    patches = patches.transpose(0, 3, 4, 1, 2)        # [N, H_out, W_out, C, kH*kW]
    return patches.reshape(N * H_out * W_out, C * kH * kW), H_out, W_out


def _choose_tp(P, K, ksm, r, max_rows=4096, vmem_budget=24 << 20):
    """Logical row-tile size: fits double-buffered tiles in VMEM on all TPU gens
    (v7x only has 64 MiB), keeps >= 2 grid steps so v7x's 2 TCs both get work."""
    align = 16 * r                                     # bf16 sublane tile x packed rows
    bytes_per_row = 2 * (K * 2) + 2 * (ksm * 4)        # 2x-buffered bf16 in + f32 out
    tp = min(max_rows, vmem_budget // bytes_per_row)
    tp = max(align, (tp // align) * align)
    P_aligned = -(-P // align) * align
    if tp >= P_aligned:
        tp = max(align, (-(-(P_aligned // 2) // align)) * align)
    return tp


@functools.partial(
    jax.jit,
    static_argnames=("m", "ks", "kernel_size", "stride", "padding",
                     "dilation", "groups"))
def pq_conv2d_forward(x, weights, biases, *, m, ks,
                      kernel_size, stride, padding, dilation, groups=1):
    # TODO(synk): grouped convolutions (groups > 1 inside each sub-conv) not supported.
    assert groups == 1
    N, C, H, W = x.shape
    kH = kW = kernel_size
    ksm = ks ** m
    K_total = C * kH * kW

    # One channel-major im2col over the full input; per-group columns are contiguous.
    # NOTE: fusing the im2col into the kernel (halo'd x blocks) is the remaining
    # HBM-traffic optimization; kept wrapper-side (jitted) here for robustness.
    patches, H_out, W_out = _im2col(x, kH, kW, stride, padding, dilation)
    P = N * H_out * W_out

    # Fold product_add's one-hot digit-selection and the biases into the weights
    # at trace time: column c of the fused weight uses digit_i(c) (MSB first).
    codes = np.arange(ksm)
    w_cols = []
    b_fused = jnp.zeros((ksm,), jnp.float32)
    for i in range(m):
        digits = (codes // (ks ** (m - 1 - i))) % ks
        w_mat = weights[i].reshape(ks, -1).T.astype(jnp.float32)   # [K_i, ks]
        w_cols.append(w_mat[:, digits])                            # [K_i, ks**m]
        b_fused = b_fused + biases[i].astype(jnp.float32)[digits]
    w_fused = jnp.concatenate(w_cols, axis=0)                      # [K_total, ks**m]

    # Pack r logical rows per kernel row so the output tile is lane-dense (128 lanes).
    if ksm % 128 == 0:
        r = 1
    elif 128 % ksm == 0:
        r = 128 // ksm
    else:
        r = 1   # fallback: output narrower than 128 lanes -> masked stores

    tp = _choose_tp(P, K_total, ksm, r)
    P_pad = ((P + tp - 1) // tp) * tp

    # bf16 streaming input; pad + row-major regroup to [P_pad//r, r*K_total].
    patches = jnp.pad(patches.astype(jnp.bfloat16), ((0, P_pad - P), (0, 0)))
    patches = patches.reshape(P_pad // r, r * K_total)

    # Block-diagonal fused weight so the packed matmul stays exact; f32 bias row.
    w_blk = jnp.kron(jnp.eye(r, dtype=jnp.float32), w_fused).astype(jnp.bfloat16)
    b_blk = jnp.tile(b_fused, r).reshape(1, r * ksm)

    rows_blk = tp // r
    grid = (P_pad // tp,)

    out = pl.pallas_call(
        _pq_kernel,
        out_shape=jax.ShapeDtypeStruct((P_pad // r, r * ksm), jnp.float32),
        grid_spec=pltpu.PrefetchScalarGridSpec(
            num_scalar_prefetch=0,
            grid=grid,
            in_specs=[
                pl.BlockSpec((rows_blk, r * K_total), lambda i: (i, 0)),
                pl.BlockSpec((r * K_total, r * ksm), lambda i: (0, 0)),
                pl.BlockSpec((1, r * ksm), lambda i: (0, 0)),
            ],
            out_specs=pl.BlockSpec((rows_blk, r * ksm), lambda i: (i, 0)),
        ),
        compiler_params=pltpu.CompilerParams(
            dimension_semantics=("parallel",)),
    )(patches, w_blk, b_blk)

    out = out.reshape(P_pad, ksm)[:P]
    # NCHW return preserves the PyTorch module contract; transpose fuses under jit.
    return out.reshape(N, H_out, W_out, ksm).transpose(0, 3, 1, 2)


# ----------------------- pure-JAX reference (for checking) -------------------
def reference_forward(x, weights, biases, ds, m, ks, stride, padding, dilation):
    ys = []
    for i in range(m):
        xi = x[:, int(ds[i]):int(ds[i + 1]), :, :]
        y = jax.lax.conv_general_dilated(
            xi, weights[i],
            window_strides=(stride, stride),
            padding=[(padding, padding), (padding, padding)],
            rhs_dilation=(dilation, dilation),
            dimension_numbers=('NCHW', 'OIHW', 'NCHW'))
        ys.append(y + biases[i][None, :, None, None])
    N = ys[0].shape[0]
    Hh, Ww = ys[0].shape[2], ys[0].shape[3]
    out = jnp.zeros((N,) + (ks,) * m + (Hh, Ww), jnp.float32)
    for i, y in enumerate(ys):
        shape = [N] + [1] * m + [Hh, Ww]
        shape[1 + i] = ks
        out = out + y.reshape(shape)
    return out.reshape(N, ks ** m, Hh, Ww)


# ---------------------------------- main --------------------------------------
if __name__ == "__main__":
    # module config: PQConv2d(in_channels=4, out_channels=16, k=3, stride=1,
    #                         padding=1, dilation=1, groups=1, bias=True, m=2, ks=4)
    in_channels, m, ks = 4, 2, 4
    out_channels = ks ** m
    kernel_size, stride, padding, dilation, groups = 3, 1, 1, 1, 1
    N, H, W = 2, 16, 16
    ds = dimension_split(in_channels, m)

    key = jax.random.PRNGKey(0)
    keys = jax.random.split(key, 2 * m + 1)
    x = jax.random.normal(keys[0], (N, in_channels, H, W), jnp.float32)

    weights, biases = [], []
    for i in range(m):
        cin_i = int(ds[i + 1] - ds[i])
        fan_in = cin_i * kernel_size * kernel_size
        bound = 1.0 / np.sqrt(fan_in)
        weights.append(jax.random.uniform(
            keys[1 + 2 * i], (ks, cin_i, kernel_size, kernel_size),
            jnp.float32, -bound, bound))
        biases.append(jax.random.uniform(
            keys[2 + 2 * i], (ks,), jnp.float32, -bound, bound))

    out = pq_conv2d_forward(x, weights, biases, m=m, ks=ks,
                            kernel_size=kernel_size, stride=stride,
                            padding=padding, dilation=dilation, groups=groups)
    out = jax.block_until_ready(out)

    H_out = (H + 2 * padding - dilation * (kernel_size - 1) - 1) // stride + 1
    W_out = (W + 2 * padding - dilation * (kernel_size - 1) - 1) // stride + 1
    assert out.shape == (N, out_channels, H_out, W_out), out.shape

    ref = reference_forward(x, weights, biases, ds, m, ks, stride, padding, dilation)
    # bf16 streaming inputs -> loosened tolerance (f32 accumulation throughout).
    np.testing.assert_allclose(np.asarray(out), np.asarray(ref), rtol=3e-2, atol=3e-2)

    print("KERNEL_OK")
</pallas_src>

<mosaic_0001>
module attributes {stable_mosaic.version = 11 : i64} {
  func.func @_pq_kernel(%arg0: i32, %arg1: memref<32x288xbf16, #tpu.memory_space<vmem>>, %arg2: memref<288x128xbf16, #tpu.memory_space<vmem>>, %arg3: memref<1x128xf32, #tpu.memory_space<vmem>>, %arg4: memref<32x128xf32, #tpu.memory_space<vmem>>) attributes {dimension_semantics = [#tpu.dimension_semantics<parallel>], iteration_bounds = array<i64: 2>, scalar_prefetch = 0 : i64, scratch_operands = 0 : i64, tpu.core_type = #tpu.core_type<tc>, window_params = [{transform_indices = @transform_0, window_bounds = array<i64: 32, 288>}, {pipeline_mode = #tpu.pipeline_mode<synchronous>, transform_indices = @transform_1, window_bounds = array<i64: 288, 128>}, {pipeline_mode = #tpu.pipeline_mode<synchronous>, transform_indices = @transform_2, window_bounds = array<i64: 1, 128>}, {transform_indices = @transform_3, window_bounds = array<i64: 32, 128>}]} {
    %c0 = arith.constant 0 : index
    %c0_0 = arith.constant 0 : index
    %0 = vector.load %arg1[%c0, %c0_0] : memref<32x288xbf16, #tpu.memory_space<vmem>>, vector<32x288xbf16>
    %c0_1 = arith.constant 0 : index
    %c0_2 = arith.constant 0 : index
    %1 = vector.load %arg2[%c0_1, %c0_2] : memref<288x128xbf16, #tpu.memory_space<vmem>>, vector<288x128xbf16>
    %cst = arith.constant dense<0.000000e+00> : vector<32x128xf32>
    %2 = tpu.matmul %0, %1, %cst {dimension_numbers = #tpu.dot_dimension_numbers<[1], [0], [0], [1], [0, 0, 1, 1], [], []>} : vector<32x288xbf16>, vector<288x128xbf16>, vector<32x128xf32> -> vector<32x128xf32>
    %c0_3 = arith.constant 0 : index
    %c0_4 = arith.constant 0 : index
    %3 = vector.load %arg3[%c0_3, %c0_4] : memref<1x128xf32, #tpu.memory_space<vmem>>, vector<1x128xf32>
    %4 = vector.broadcast %3 : vector<1x128xf32> to vector<32x128xf32>
    %5 = arith.addf %2, %4 : vector<32x128xf32>
    %c0_5 = arith.constant 0 : index
    %c0_6 = arith.constant 0 : index
    %6 = vector.load %arg4[%c0_5, %c0_6] : memref<32x128xf32, #tpu.memory_space<vmem>>, vector<32x128xf32>
    tpu.vector_store %arg4[%c0_5, %c0_6], %5 {strides = array<i32>} : memref<32x128xf32, #tpu.memory_space<vmem>>, vector<32x128xf32>,
    return
  }
  func.func @transform_0(%arg0: i32) -> (i32, i32) {
    %c0_i32 = arith.constant 0 : i32
    %c0_i32_0 = arith.constant 0 : i32
    return %arg0, %c0_i32 : i32, i32
  }
  func.func @transform_1(%arg0: i32) -> (i32, i32) {
    %c0_i32 = arith.constant 0 : i32
    %c0_i32_0 = arith.constant 0 : i32
    %c0_i32_1 = arith.constant 0 : i32
    return %c0_i32, %c0_i32_0 : i32, i32
  }
  func.func @transform_2(%arg0: i32) -> (i32, i32) {
    %c0_i32 = arith.constant 0 : i32
    %c0_i32_0 = arith.constant 0 : i32
    %c0_i32_1 = arith.constant 0 : i32
    return %c0_i32, %c0_i32_0 : i32, i32
  }
  func.func @transform_3(%arg0: i32) -> (i32, i32) {
    %c0_i32 = arith.constant 0 : i32
    %c0_i32_0 = arith.constant 0 : i32
    return %arg0, %c0_i32 : i32, i32
  }
}

</mosaic_0001>

<bundles_post_ra>
// kernel: tile.8
= control target key start
LH: loop header
LB: loop body
LE: loop exit
PB: predicated region body
PF: predicated region fallthrough
CT: control target
= control target key end

     0   :  { %s22_s0 = inlined_call_operand.vmem [shape: f32[16], index: 0, kind: input, shape index: {}]   ;;  %s23_s1 = inlined_call_operand.vmem [shape: f32[8,16], index: 1, kind: output, shape index: {}]  }
   0x1   :  { %v4_v0 = vld [vmem:[%s22_s0] ss:$0 sm:$0xff] }
   0x2   :  { %5 = vst [vmem:[%s23_s1] sm:$0xff] %v4_v0 }

// kernel: tile.9
= control target key start
LH: loop header
LB: loop body
LE: loop exit
PB: predicated region body
PF: predicated region fallthrough
CT: control target
= control target key end

     0   :  { %s69_s10 = smov 112   ;;  %s70_s11 = smov 80   ;;  %vm3_vm0 = vcmask 130048   ;;  %vm9_vm1 = vcmask 1048448   ;;  %vm15_vm2 = vcmask 917248   ;;  %vm21_vm3 = vcmask 786048   ;;  %s113_s0 = inlined_call_operand.vmem [shape: f32[8,16], index: 0, kind: input, shape index: {}]   ;;  %s114_s1 = inlined_call_operand.vmem [shape: f32[1,128], index: 1, kind: output, shape index: {}]  }
   0x1   :  { %v55_v0 = vld [vmem:[%s113_s0 + $0x7] sm:$0x1]   ;;  %v57_v1 = vld [vmem:[%s113_s0 + $0x5] sm:$0x1]   ;;  %v56_v2 = vld [vmem:[%s113_s0 + $0x6] sm:$0x1]  }
   0x2   :  { %7 = vrot.lane.b32.xlu0 %v55_v0, %s69_s10  ;;  %19 = vrot.lane.b32.xlu1 %v57_v1, %s70_s11  ;;  %v58_v3 = vld [vmem:[%s113_s0 + $0x4] sm:$0x1]   ;;  %v2_v4 = vld [vmem:[%s113_s0] sm:$0x1]   ;;  %s71_s18 = smov 96   ;;  %s72_s19 = smov 64  }
   0x3   :  { %4 = vst.msk [vmem:[#allocation0] sm:$0x1] %vm3_vm0, %v2_v4   ;;  %v59_v5 = vld [vmem:[%s113_s0 + $0x3] sm:$0x1]   ;;  %v60_v6 = vld [vmem:[%s113_s0 + $0x2] sm:$0x1]  }
   0x4   :  { %s73_s24 = smov 48   ;;  %s74_s25 = smov 32   ;;  %v61_v7 = vld [vmem:[%s113_s0 + $0x1] sm:$0x1]   ;;  %vm27_vm4 = vcmask 654848   ;;  %vm33_vm5 = vcmask 523648  }
   0x5   :  { %s75_s0 = smov 16   ;;  %vm39_vm6 = vcmask 392448   ;;  %vm45_vm7 = vcmask 261248  }
   0x6   :  { %13 = vrot.lane.b32.xlu0 %v56_v2, %s71_s18  ;;  %25 = vrot.lane.b32.xlu1 %v58_v3, %s72_s19 }
   0xa   :  { %31 = vrot.lane.b32.xlu0 %v59_v5, %s73_s24  ;;  %37 = vrot.lane.b32.xlu1 %v60_v6, %s74_s25 }
   0xe   :  { %43 = vrot.lane.b32.xlu0 %v61_v7, %s75_s0 }
  0x74   :  { %v8_v8 = vpop.permute.xlu0 %7   ;;  %v20_v9 = vpop.permute.xlu1 %19  }
  0x75   :  { %10 = vst.msk [vmem:[#allocation0] sm:$0x1] %vm9_vm1, %v8_v8  }
  0x78   :  { %v14_v10 = vpop.permute.xlu0 %13   ;;  %v26_v11 = vpop.permute.xlu1 %25  }
  0x79   :  { %16 = vst.msk [vmem:[#allocation0] sm:$0x1] %vm15_vm2, %v14_v10  }
  0x7a   :  { %22 = vst.msk [vmem:[#allocation0] sm:$0x1] %vm21_vm3, %v20_v9  }
  0x7b   :  { %28 = vst.msk [vmem:[#allocation0] sm:$0x1] %vm27_vm4, %v26_v11  }
  0x7c   :  { %v32_v12 = vpop.permute.xlu0 %31   ;;  %v38_v13 = vpop.permute.xlu1 %37  }
  0x7d   :  { %34 = vst.msk [vmem:[#allocation0] sm:$0x1] %vm33_vm5, %v32_v12  }
  0x7e   :  { %40 = vst.msk [vmem:[#allocation0] sm:$0x1] %vm39_vm6, %v38_v13  }
  0x80   :  { %v44_v14 = vpop.permute.xlu0 %43  }
  0x81   :  { %46 = vst.msk [vmem:[#allocation0] sm:$0x1] %vm45_vm7, %v44_v14  }
  0x88   :  { %v51_v15 = vld [vmem:[#allocation0] sm:$0x1] }
  0x89   :  { %54 = vst [vmem:[%s114_s1] sm:$0x1] %v51_v15 }

// kernel: pq_conv2d_forward.1
= control target key start
LH: loop header
LB: loop body
LE: loop exit
PB: predicated region body
PF: predicated region fallthrough
CT: control target
= control target key end

     0   :  { %s673_s12 = smov 0   ;;  %s759_s0 = inlined_call_operand.vmem [shape: bf16[64,288], index: 0, kind: input, shape index: {}]   ;;  %s760_s1 = inlined_call_operand.vmem [shape: bf16[288,128], index: 1, kind: input, shape index: {}]   ;;  %s761_s2 = inlined_call_operand.vmem [shape: f32[1,128], index: 2, kind: input, shape index: {}]   ;;  %s762_s3 = inlined_call_operand.vmem [shape: f32[64,128], index: 3, kind: output, shape index: {}]  }
   0x1 LB: > { %s532_s13 = sadd.s32 4294967295, %s651_s12   ;;  %p536_p0 = scmp.ge.s32.totalorder %s651_s12, 1  ;;  %s651_s12 = sphi %s673_s12, %s13_s12  }
   0x2   : > { %p139_p1 = scmp.lt.s32.totalorder %s651_s12, 3 }
   0x4   : > { %p140_p2 = pnand %p536_p0, %p139_p1 }
   0x5   : > { %s537_s16 = sshll.u32 (!%p140_p2), %s532_s13, 2 }
   0x6   : > { %143 = sbr.rel (%p140_p2) target bundleno = 258 (0x102), region = 32  ;;  %p165_p3 = scmp.lt.s32.totalorder (!%p140_p2), %s537_s16, 7 }
   0xb   : > { %v619_v0 = vld [vmem:[%s760_s1 + $0x78] sm:$0xff]   ;;  %v621_v2 = vld [vmem:[%s760_s1 + $0x70] sm:$0xff]   ;;  %v623_v4 = vld [vmem:[%s760_s1 + $0x68] sm:$0xff]   ;;  %s764_s16 = smov (!%p165_p3, %s537_s16), 7  ;;  %vm367_vm0 = vcmask 261120  }
   0xc   : > { %v620_v1 = vld [vmem:[%s760_s1 + $0x38] sm:$0xff]   ;;  %570 = vmatprep.subr.bf16.mxu0 %v619_v0  ;;  %v622_v3 = vld [vmem:[%s760_s1 + $0x30] sm:$0xff]   ;;  %v624_v5 = vld [vmem:[%s760_s1 + $0x28] sm:$0xff]   ;;  %s610_s4 = smul.u32 12, %s764_s16  ;;  %s540_s5 = sshll.u32 %s764_s16, 3 }
   0xd   : > { %571 = vmatpush3.bf16.msra.mxu0 %v620_v1  ;;  %v625_v6 = vld [vmem:[%s760_s1 + $0x60] sm:$0xff]   ;;  %v627_v8 = vld [vmem:[%s760_s1 + $0x58] sm:$0xff]   ;;  %v634_v10 = vld [vmem:[%s760_s1 + $0x88] sm:$0xff]   ;;  %s175_s8 = scalar_lea.vmem %s762_s3, %s540_s5 }
   0xe   : > { %572 = vmatprep.subr.bf16.mxu0 %v621_v2  ;;  %v626_v7 = vld [vmem:[%s760_s1 + $0x20] sm:$0xff]   ;;  %v628_v9 = vld [vmem:[%s760_s1 + $0x18] sm:$0xff]   ;;  %s720_s14 = scalar_lea.vmem %s759_s0, %s610_s4  ;;  %v629_v11 = vld [vmem:[%s760_s1 + $0x50] sm:$0xff]   ;;  %602 = vmatprep.subr.bf16.mxu1 %v634_v10 }
   0xf   : > { %v630_v12 = vld [vmem:[%s760_s1 + $0x10] sm:$0xff]   ;;  %v631_v13 = vld [vmem:[%s760_s1 + $0x48] sm:$0xff]   ;;  %603 = vmatpush3.bf16.msra.mxu1 %v634_v10  ;;  %v639_v15 = vld [vmem:[%s760_s1 + $0x80] sm:$0xff]  }
  0x10   : > { %v638_v14 = vld [vmem:[%s720_s14 + $0x4] ss:$12 sps:$4 sm:$0xff]   ;;  %v640_v16 = vld [vmem:[%s720_s14 + $0x8] ss:$12 sps:$4 sm:$0xff]   ;;  %604 = vmatprep.subr.bf16.mxu1 %v639_v15  ;;  %v641_v17 = vld [vmem:[%s720_s14 + $0x20] ss:$12 sps:$4 sm:$0xff]  }
  0x11   : > { %573 = vmatpush3.bf16.msra.mxu0 %v622_v3  ;;  %406 = vmatprep.mubr.bf16.mxu0 %v638_v14  ;;  %v632_v18 = vld [vmem:[%s760_s1 + $0x8] sm:$0xff]   ;;  %v633_v19 = vld [vmem:[%s760_s1 + $0x40] sm:$0xff]  }
  0x12   : > { %574 = vmatprep.subr.bf16.mxu0 %v623_v4  ;;  %606 = vmatprep.mubr.msk.bf16.mxu1 %vm367_vm0, %v640_v16  ;;  %v635_v20 = vld [vmem:[%s760_s1] sm:$0xff]   ;;  %v642_v22 = vld [vmem:[%s720_s14 + $0x1c] ss:$12 sps:$4 sm:$0xff]  }
  0x13   : > { %605 = vmatpush3.bf16.msra.mxu1 %v639_v15  ;;  %v636_v21 = vld [vmem:[%s720_s14] ss:$12 sps:$4 sm:$0xff]   ;;  %v644_v23 = vld [vmem:[%s720_s14 + $0x18] ss:$12 sps:$4 sm:$0xff]  }
  0x14   : > { %v541_v28 = vld [vmem:[%s761_s2] ss:$0 sm:$0xff] }
  0x15   : > { %575 = vmatpush3.bf16.msra.mxu0 %v624_v5 }
  0x16   : > { %576 = vmatprep.subr.bf16.mxu0 %v625_v6  ;;  %607 = vmatmul.mubr.msk.bf16.vlgmr.msra.gmra.mxu1 %vm367_vm0, %v641_v17 }
  0x19   : > { %577 = vmatpush3.bf16.msra.mxu0 %v626_v7 }
  0x1a   : > { %578 = vmatprep.subr.bf16.mxu0 %v627_v8 }
  0x1d   : > { %579 = vmatpush3.bf16.msra.mxu0 %v628_v9 }
  0x1e   : > { %580 = vmatprep.subr.bf16.mxu0 %v629_v11 }
  0x21   : > { %581 = vmatpush3.bf16.msra.mxu0 %v630_v12 }
  0x22   : > { %582 = vmatprep.subr.bf16.mxu0 %v631_v13 }
  0x25   : > { %583 = vmatpush3.bf16.msra.mxu0 %v632_v18 }
  0x26   : > { %584 = vmatprep.subr.bf16.mxu0 %v633_v19 }
  0x29   : > { %585 = vmatpush3.bf16.msra.mxu0 %v635_v20 }
  0x2c   : > { %407 = vmatmul.mubr.bf16.vlgmr.msra.gmra.mxu0 %v636_v21 }
  0x2d   : > { %414 = vmatprep.mubr.bf16.mxu0 %v642_v22 }
  0x34   : > { %415 = vmatmul.mubr.bf16.gmra.mxu0 %v644_v23 }
  0xd6   : > { %v608_v24 = vpop.f32.mrf.mxu1 }
  0xd8   : > { %v457_v26 = vpop.f32.mrf.mxu1 }
  0xda   : > { %v609_v31 = vpop.f32.mrf.mxu1 }
  0xdc   : > { %v460_v37 = vpop.f32.mrf.mxu1 }
  0xec   : > { %v586_v25 = vpop.f32.mrf.mxu0 }
  0xee   : > { %v587_v27 = vpop.f32.mrf.mxu0 }
  0xef   : > { %v588_v29 = vadd.f32 %v587_v27, %v586_v25 }
  0xf0   : > { %v589_v30 = vpop.f32.mrf.mxu0 }
  0xf1   : > { %v409_v32 = vadd.f32 %v588_v29, %v541_v28 }
  0xf2   : > { %v590_v33 = vpop.f32.mrf.mxu0 }
  0xf3   : > { %v591_v34 = vadd.f32 %v590_v33, %v589_v30  ;;  %v458_v35 = vadd.f32 %v457_v26, %v409_v32 }
  0xf4   : > { %v592_v36 = vpop.f32.mrf.mxu0 }
  0xf5   : > { %472 = vst [vmem:[%s175_s8] sm:$0xff] %v458_v35  ;;  %v412_v38 = vadd.f32 %v591_v34, %v541_v28 }
  0xf6   : > { %v593_v39 = vpop.f32.mrf.mxu0 }
  0xf7   : > { %v594_v40 = vadd.f32 %v593_v39, %v592_v36  ;;  %v461_v41 = vadd.f32 %v460_v37, %v412_v38 }
  0xf8   : > { %v595_v42 = vpop.f32.mrf.mxu0 }
  0xf9   : > { %v417_v43 = vadd.f32 %v594_v40, %v541_v28  ;;  %473 = vst [vmem:[%s175_s8 + $0x8] sm:$0xff] %v461_v41 }
  0xfa   : > { %v596_v44 = vpop.f32.mrf.mxu0 }
  0xfb   : > { %v466_v45 = vadd.f32 %v608_v24, %v417_v43  ;;  %v597_v46 = vadd.f32 %v596_v44, %v595_v42 }
  0xfd   : > { %474 = vst [vmem:[%s175_s8 + $0x10] sm:$0xff] %v466_v45  ;;  %v420_v47 = vadd.f32 %v597_v46, %v541_v28 }
  0xff   : > { %v469_v48 = vadd.f32 %v609_v31, %v420_v47 }
 0x101   : > { %475 = vst [vmem:[%s175_s8 + $0x18] sm:$0xff] %v469_v48 }
 0x102 PF: > { %s13_s12 = sadd.s32 1, %s651_s12  }
 0x103   : > { %p10_p4 = scmp.ge.s32.totalorder %s13_s12, 4  }
 0x105   :  { %12 = sbr.rel (!%p10_p4) target bundleno = 1 (0x1), region = 62 }

</bundles_post_ra>
